<compile_context>
chip_gen: v7x
topology: tpu7x:2x2x1
jax: 0.10.0
libtpu: 0.0.40
codegen_flags: <defaults>
</compile_context>

<pallas_src>
import functools
import math

import jax
import jax.numpy as jnp
from jax import lax
from jax.experimental import pallas as pl
from jax.experimental.pallas import tpu as pltpu


def _round_up(x, m):
    return ((x + m - 1) // m) * m


def _noisy_linear_kernel(x_ref, wmu_ref, wsig_ref, eps_out_ref, eps_in_ref,
                         beff_ref, o_ref, acc_ref, *, matmul_dtype):
    k = pl.program_id(2)

    @pl.when(k == 0)
    def _():
        acc_ref[...] = jnp.zeros_like(acc_ref)

    # Factorized noise formed on the fly: eps_tile = eps_out (tn,1) * eps_in (1,tk).
    # Elementwise math stays f32 (v5e VPU has no bf16); only MXU operands cast.
    w = wmu_ref[...] + wsig_ref[...] * (eps_out_ref[...] * eps_in_ref[...])

    # Transpose-free x @ W.T: contract x(tm,tk) with w(tn,tk) on their last dims.
    acc_ref[...] += lax.dot_general(
        x_ref[...].astype(matmul_dtype), w.astype(matmul_dtype),
        dimension_numbers=(((1,), (1,)), ((), ())),
        preferred_element_type=jnp.float32)

    @pl.when(k == pl.num_programs(2) - 1)
    def _():
        o_ref[...] = (acc_ref[...] + beff_ref[...]).astype(o_ref.dtype)


def noisy_linear(x, weight_mu, weight_sigma, bias_mu, bias_sigma,
                 eps_in, eps_out, *, tm=256, tn=256, tk=256,
                 matmul_dtype=jnp.float32):
    """y = x @ (weight_mu + weight_sigma * outer(eps_out, eps_in)).T
           + (bias_mu + bias_sigma * eps_out)"""
    B, In = x.shape
    Out, In_w = weight_mu.shape
    assert In_w == In

    # Clamp tile sizes to the (padded) problem size, keeping TPU alignment:
    # tm multiple of 8 (sublanes), tn/tk multiples of 128 (lanes / MXU).
    tm = min(tm, _round_up(B, 8))
    tn = min(tn, _round_up(Out, 128))
    tk = min(tk, _round_up(In, 128))

    Bp = _round_up(B, tm)
    Outp = _round_up(Out, tn)
    Inp = _round_up(In, tk)

    def pad2(a, r, c):
        return jnp.pad(a, ((0, r - a.shape[0]), (0, c - a.shape[1])))

    xp = pad2(x, Bp, Inp)
    wmu = pad2(weight_mu, Outp, Inp)
    wsig = pad2(weight_sigma, Outp, Inp)
    eo = pad2(eps_out.reshape(Out, 1), Outp, 1)
    ei = pad2(eps_in.reshape(1, In), 1, Inp)
    # bias_epsilon == eps_out (factorized noise): fold the bias once here.
    beff = pad2((bias_mu + bias_sigma * eps_out).reshape(1, Out), 1, Outp)

    grid = (Bp // tm, Outp // tn, Inp // tk)

    out = pl.pallas_call(
        functools.partial(_noisy_linear_kernel, matmul_dtype=matmul_dtype),
        out_shape=jax.ShapeDtypeStruct((Bp, Outp), x.dtype),
        grid_spec=pltpu.PrefetchScalarGridSpec(
            num_scalar_prefetch=0,
            grid=grid,
            in_specs=[
                pl.BlockSpec((tm, tk), lambda i, j, k: (i, k)),   # x
                pl.BlockSpec((tn, tk), lambda i, j, k: (j, k)),   # weight_mu
                pl.BlockSpec((tn, tk), lambda i, j, k: (j, k)),   # weight_sigma
                pl.BlockSpec((tn, 1),  lambda i, j, k: (j, 0)),   # eps_out
                pl.BlockSpec((1, tk),  lambda i, j, k: (0, k)),   # eps_in
                pl.BlockSpec((1, tn),  lambda i, j, k: (0, j)),   # fused bias
            ],
            out_specs=pl.BlockSpec((tm, tn), lambda i, j, k: (i, j)),
            scratch_shapes=[pltpu.VMEM((tm, tn), jnp.float32)],
        ),
        compiler_params=pltpu.CompilerParams(
            dimension_semantics=("parallel", "parallel", "arbitrary")),
    )(xp, wmu, wsig, eo, ei, beff)

    return out[:B, :Out]


def scale_noise(key, size):
    """Factorized gaussian noise: sign(x) * sqrt(|x|), x ~ N(0,1)."""
    x = jax.random.normal(key, (size,), dtype=jnp.float32)
    return jnp.sign(x) * jnp.sqrt(jnp.abs(x))


def init_noisy_linear(key, input_size, output_size, std_init=0.5):
    """Re-implementation of NoisyLinear.__init__ / reset_parameters / reset_noise."""
    k_wmu, k_bmu, k_ein, k_eout = jax.random.split(key, 4)
    mu_range = 1.0 / math.sqrt(input_size)
    weight_mu = jax.random.uniform(
        k_wmu, (output_size, input_size), jnp.float32, -mu_range, mu_range)
    weight_sigma = jnp.full((output_size, input_size),
                            std_init / math.sqrt(input_size), jnp.float32)
    bias_mu = jax.random.uniform(
        k_bmu, (output_size,), jnp.float32, -mu_range, mu_range)
    bias_sigma = jnp.full((output_size,),
                          std_init / math.sqrt(output_size), jnp.float32)
    eps_in = scale_noise(k_ein, input_size)
    eps_out = scale_noise(k_eout, output_size)
    return dict(weight_mu=weight_mu, weight_sigma=weight_sigma,
                bias_mu=bias_mu, bias_sigma=bias_sigma,
                eps_in=eps_in, eps_out=eps_out)


def _reference(x, p):
    w_eff = p["weight_mu"] + p["weight_sigma"] * jnp.outer(p["eps_out"], p["eps_in"])
    b_eff = p["bias_mu"] + p["bias_sigma"] * p["eps_out"]
    return x @ w_eff.T + b_eff


if __name__ == "__main__":
    key = jax.random.PRNGKey(0)
    k_param, k_x, k_param2, k_x2 = jax.random.split(key, 4)

    # Small shapes consistent with the module (RL Q-network-sized layer).
    batch, input_size, output_size = 8, 32, 16
    params = init_noisy_linear(k_param, input_size, output_size, std_init=0.5)
    x = jax.random.normal(k_x, (batch, input_size), dtype=jnp.float32)

    y = noisy_linear(x, params["weight_mu"], params["weight_sigma"],
                     params["bias_mu"], params["bias_sigma"],
                     params["eps_in"], params["eps_out"])
    y = jax.block_until_ready(y)
    y_ref = _reference(x, params)
    assert y.shape == (batch, output_size)
    assert jnp.allclose(y, y_ref, atol=1e-5, rtol=1e-5)

    # Second check exercising a multi-tile (n, k) grid with the accumulator path.
    batch2, in2, out2 = 8, 200, 150
    params2 = init_noisy_linear(k_param2, in2, out2, std_init=0.5)
    x2 = jax.random.normal(k_x2, (batch2, in2), dtype=jnp.float32)
    y2 = jax.block_until_ready(
        noisy_linear(x2, params2["weight_mu"], params2["weight_sigma"],
                     params2["bias_mu"], params2["bias_sigma"],
                     params2["eps_in"], params2["eps_out"],
                     tm=8, tn=128, tk=128))
    assert jnp.allclose(y2, _reference(x2, params2), atol=1e-4, rtol=1e-4)

    # bf16 MXU-operand path (v6e/v7x fast path); looser tolerance for bf16.
    y_bf16 = jax.block_until_ready(
        noisy_linear(x, params["weight_mu"], params["weight_sigma"],
                     params["bias_mu"], params["bias_sigma"],
                     params["eps_in"], params["eps_out"],
                     matmul_dtype=jnp.bfloat16))
    assert jnp.allclose(y_bf16, y_ref, atol=3e-2, rtol=3e-2)

    print("KERNEL_OK")
</pallas_src>

<mosaic_0001>
module attributes {stable_mosaic.version = 11 : i64} {
  func.func @_noisy_linear_kernel(%arg0: i32, %arg1: i32, %arg2: i32, %arg3: memref<8x128xf32, #tpu.memory_space<vmem>>, %arg4: memref<128x128xf32, #tpu.memory_space<vmem>>, %arg5: memref<128x128xf32, #tpu.memory_space<vmem>>, %arg6: memref<128x1xf32, #tpu.memory_space<vmem>>, %arg7: memref<1x128xf32, #tpu.memory_space<vmem>>, %arg8: memref<1x128xf32, #tpu.memory_space<vmem>>, %arg9: memref<8x128xf32, #tpu.memory_space<vmem>>, %arg10: memref<8x128xf32, #tpu.memory_space<vmem>>) attributes {dimension_semantics = [#tpu.dimension_semantics<parallel>, #tpu.dimension_semantics<parallel>, #tpu.dimension_semantics<arbitrary>], iteration_bounds = array<i64: 1, 1, 1>, scalar_prefetch = 0 : i64, scratch_operands = 1 : i64, tpu.core_type = #tpu.core_type<tc>, window_params = [{transform_indices = @transform_0, window_bounds = array<i64: 8, 128>}, {transform_indices = @transform_1, window_bounds = array<i64: 128, 128>}, {transform_indices = @transform_2, window_bounds = array<i64: 128, 128>}, {transform_indices = @transform_3, window_bounds = array<i64: 128, 1>}, {transform_indices = @transform_4, window_bounds = array<i64: 1, 128>}, {transform_indices = @transform_5, window_bounds = array<i64: 1, 128>}, {transform_indices = @transform_6, window_bounds = array<i64: 8, 128>}]} {
    %c0_i32 = arith.constant 0 : i32
    %0 = arith.cmpi eq, %arg2, %c0_i32 : i32
    %1 = arith.extui %0 : i1 to i32
    %c0_i32_0 = arith.constant 0 : i32
    %2 = arith.cmpi ne, %1, %c0_i32_0 : i32
    scf.if %2 {
      %cst_16 = arith.constant 0.000000e+00 : f32
      %20 = vector.broadcast %cst_16 : f32 to vector<8x128xf32>
      %c0_17 = arith.constant 0 : index
      %c0_18 = arith.constant 0 : index
      %21 = vector.load %arg10[%c0_17, %c0_18] : memref<8x128xf32, #tpu.memory_space<vmem>>, vector<8x128xf32>
      tpu.vector_store %arg10[%c0_17, %c0_18], %20 {strides = array<i32>} : memref<8x128xf32, #tpu.memory_space<vmem>>, vector<8x128xf32>,
    } else {
    }
    %c0 = arith.constant 0 : index
    %c0_1 = arith.constant 0 : index
    %3 = vector.load %arg4[%c0, %c0_1] : memref<128x128xf32, #tpu.memory_space<vmem>>, vector<128x128xf32>
    %c0_2 = arith.constant 0 : index
    %c0_3 = arith.constant 0 : index
    %4 = vector.load %arg5[%c0_2, %c0_3] : memref<128x128xf32, #tpu.memory_space<vmem>>, vector<128x128xf32>
    %c0_4 = arith.constant 0 : index
    %c0_5 = arith.constant 0 : index
    %5 = vector.load %arg6[%c0_4, %c0_5] : memref<128x1xf32, #tpu.memory_space<vmem>>, vector<128x1xf32>
    %c0_6 = arith.constant 0 : index
    %c0_7 = arith.constant 0 : index
    %6 = vector.load %arg7[%c0_6, %c0_7] : memref<1x128xf32, #tpu.memory_space<vmem>>, vector<1x128xf32>
    %7 = vector.broadcast %5 : vector<128x1xf32> to vector<128x128xf32>
    %8 = vector.broadcast %6 : vector<1x128xf32> to vector<128x128xf32>
    %9 = arith.mulf %7, %8 : vector<128x128xf32>
    %10 = arith.mulf %4, %9 : vector<128x128xf32>
    %11 = arith.addf %3, %10 : vector<128x128xf32>
    %c0_8 = arith.constant 0 : index
    %c0_9 = arith.constant 0 : index
    %12 = vector.load %arg10[%c0_8, %c0_9] : memref<8x128xf32, #tpu.memory_space<vmem>>, vector<8x128xf32>
    %c0_10 = arith.constant 0 : index
    %c0_11 = arith.constant 0 : index
    %13 = vector.load %arg3[%c0_10, %c0_11] : memref<8x128xf32, #tpu.memory_space<vmem>>, vector<8x128xf32>
    %cst = arith.constant dense<0.000000e+00> : vector<8x128xf32>
    %14 = tpu.matmul %13, %11, %cst {dimension_numbers = #tpu.dot_dimension_numbers<[1], [1], [0], [0], [0, 0, 1, 0], [], []>} : vector<8x128xf32>, vector<128x128xf32>, vector<8x128xf32> -> vector<8x128xf32>
    %15 = arith.addf %12, %14 : vector<8x128xf32>
    %c0_12 = arith.constant 0 : index
    %c0_13 = arith.constant 0 : index
    %16 = vector.load %arg10[%c0_12, %c0_13] : memref<8x128xf32, #tpu.memory_space<vmem>>, vector<8x128xf32>
    tpu.vector_store %arg10[%c0_12, %c0_13], %15 {strides = array<i32>} : memref<8x128xf32, #tpu.memory_space<vmem>>, vector<8x128xf32>,
    %c0_i32_14 = arith.constant 0 : i32
    %17 = arith.cmpi eq, %arg2, %c0_i32_14 : i32
    %18 = arith.extui %17 : i1 to i32
    %c0_i32_15 = arith.constant 0 : i32
    %19 = arith.cmpi ne, %18, %c0_i32_15 : i32
    scf.if %19 {
      %c0_16 = arith.constant 0 : index
      %c0_17 = arith.constant 0 : index
      %20 = vector.load %arg10[%c0_16, %c0_17] : memref<8x128xf32, #tpu.memory_space<vmem>>, vector<8x128xf32>
      %c0_18 = arith.constant 0 : index
      %c0_19 = arith.constant 0 : index
      %21 = vector.load %arg8[%c0_18, %c0_19] : memref<1x128xf32, #tpu.memory_space<vmem>>, vector<1x128xf32>
      %22 = vector.broadcast %21 : vector<1x128xf32> to vector<8x128xf32>
      %23 = arith.addf %20, %22 : vector<8x128xf32>
      %c0_20 = arith.constant 0 : index
      %c0_21 = arith.constant 0 : index
      %24 = vector.load %arg9[%c0_20, %c0_21] : memref<8x128xf32, #tpu.memory_space<vmem>>, vector<8x128xf32>
      tpu.vector_store %arg9[%c0_20, %c0_21], %23 {strides = array<i32>} : memref<8x128xf32, #tpu.memory_space<vmem>>, vector<8x128xf32>,
    } else {
    }
    return
  }
  func.func @transform_0(%arg0: i32, %arg1: i32, %arg2: i32) -> (i32, i32) {
    %c0_i32 = arith.constant 0 : i32
    return %arg0, %arg2 : i32, i32
  }
  func.func @transform_1(%arg0: i32, %arg1: i32, %arg2: i32) -> (i32, i32) {
    %c0_i32 = arith.constant 0 : i32
    return %arg1, %arg2 : i32, i32
  }
  func.func @transform_2(%arg0: i32, %arg1: i32, %arg2: i32) -> (i32, i32) {
    %c0_i32 = arith.constant 0 : i32
    return %arg1, %arg2 : i32, i32
  }
  func.func @transform_3(%arg0: i32, %arg1: i32, %arg2: i32) -> (i32, i32) {
    %c0_i32 = arith.constant 0 : i32
    %c0_i32_0 = arith.constant 0 : i32
    return %arg1, %c0_i32 : i32, i32
  }
  func.func @transform_4(%arg0: i32, %arg1: i32, %arg2: i32) -> (i32, i32) {
    %c0_i32 = arith.constant 0 : i32
    %c0_i32_0 = arith.constant 0 : i32
    return %c0_i32, %arg2 : i32, i32
  }
  func.func @transform_5(%arg0: i32, %arg1: i32, %arg2: i32) -> (i32, i32) {
    %c0_i32 = arith.constant 0 : i32
    %c0_i32_0 = arith.constant 0 : i32
    return %c0_i32, %arg1 : i32, i32
  }
  func.func @transform_6(%arg0: i32, %arg1: i32, %arg2: i32) -> (i32, i32) {
    %c0_i32 = arith.constant 0 : i32
    return %arg0, %arg1 : i32, i32
  }
}

</mosaic_0001>

<bundles_post_ra>
// kernel: tpu_custom_call.1
= control target key start
LH: loop header
LB: loop body
LE: loop exit
PB: predicated region body
PF: predicated region fallthrough
CT: control target
= control target key end

     0   :  { %11 = vsyncpa [#allocation4], 0  ;;  %s717_s0 = inlined_call_operand.hbm [shape: f32[8,128], index: 0, kind: input, shape index: {}]   ;;  %s718_s1 = inlined_call_operand.vmem [shape: f32[128,128], index: 1, kind: input, shape index: {}]   ;;  %s719_s2 = inlined_call_operand.hbm [shape: f32[128,128], index: 2, kind: input, shape index: {}]   ;;  %s720_s3 = inlined_call_operand.vmem [shape: f32[128,1], index: 3, kind: input, shape index: {}]   ;;  %s721_s4 = inlined_call_operand.vmem [shape: f32[1,128], index: 4, kind: input, shape index: {}]   ;;  %s722_s5 = inlined_call_operand.vmem [shape: f32[1,128], index: 5, kind: input, shape index: {}]   ;;  %s723_s6 = inlined_call_operand.hbm [shape: f32[8,128], index: 6, kind: output, shape index: {}]  }
   0x1   :  { %12 = vsyncpa [#allocation7], 0 }
   0x2   :  { %13 = vsyncpa [#allocation5], 0  ;;  %s502_s21 = smov [#allocation3]   ;;  %s503_s23 = smov [#allocation6]  }
   0x3   :  { %s20_s22 = sshll.u32 %s502_s21, 4  ;;  %s31_s24 = sshll.u32 %s503_s23, 4  ;;  %s21_s22 = int_to_ptr.vmem [resolvable:$true] %s20_s22  ;;  %s546_s24 = int_to_ptr.vmem [resolvable:$true] %s31_s24 }
   0x4   :  { %s430_s27 = scalar_lea.hbm %s717_s0, 128 }
   0x5   :  { %p431_p0 = scmp.ne.s32.totalorder %s717_s0, %s430_s27  ;;  %p434_p1 = scmp.lt.u32.totalorder %s430_s27, %s717_s0 }
   0x7   :  { %p436_p2 = pnand %p434_p1, %p431_p0 }
   0x9   :  { %439 = shalt.err (!%p436_p2)
}
   0xa   :  { %s440_s8 = scalar_lea.vmem %s21_s22, 128  ;;  %p445_p4 = scmp.lt.s32.totalorder %s21_s22, %s21_s22 }
   0xb   :  { %p441_p3 = scmp.ne.s32.totalorder %s21_s22, %s440_s8  ;;  %p446_p5 = scmp.lt.s32.totalorder %s440_s8, %s440_s8 }
   0xd   :  { %p447_p6 = por %p446_p5, %p445_p4 }
   0xf   :  { %p448_p7 = pnand %p447_p6, %p441_p3 }
  0x11   :  { %451 = shalt.err (!%p448_p7)
}
  0x12   :  { %23 = dma.hbm_to_vmem [thread:$0]  %s717_s0, 128, %s21_s22, [#allocation4]  }
  0x13   :  { %s452_s13 = scalar_lea.hbm %s719_s2, 2048 }
  0x14   :  { %p453_p8 = scmp.ne.s32.totalorder %s719_s2, %s452_s13  ;;  %p456_p9 = scmp.lt.u32.totalorder %s452_s13, %s719_s2 }
  0x16   :  { %p458_p10 = pnand %p456_p9, %p453_p8 }
  0x18   :  { %461 = shalt.err (!%p458_p10)
}
  0x19   :  { %s462_s18 = scalar_lea.vmem %s546_s24, 2048  ;;  %p467_p12 = scmp.lt.s32.totalorder %s546_s24, %s546_s24 }
  0x1a   :  { %p463_p11 = scmp.ne.s32.totalorder %s546_s24, %s462_s18  ;;  %p468_p13 = scmp.lt.s32.totalorder %s462_s18, %s462_s18 }
  0x1c   :  { %p469_p0 = por %p468_p13, %p467_p12 }
  0x1e   :  { %p470_p1 = pnand %p469_p0, %p463_p11 }
  0x20   :  { %473 = shalt.err (!%p470_p1)
}
  0x21   :  { %s504_s0 = smov 128   ;;  %s505_s19 = smov 8  }
  0x22   :  { %37 = dma.hbm_to_vmem [thread:$0]  %s719_s2, 2048, %s546_s24, [#allocation7], %s504_s0, %s504_s0, %s505_s19  }
  0x23   :  { %496 = dma.done.wait [#allocation4], 128  }
  0x24   :  { %497 = vsyncadd [#allocation4], 4294967168 }
  0x25   :  { %498 = dma.done.wait [#allocation7], 2048  }
  0x26   :  { %499 = vsyncadd [#allocation7], 4294965248  ;;  %v506_v0 = vmov 0   ;;  %v89_v1 = vld [vmem:[%s720_s3 + $0x10] sm:$0xff]  ;;  %v87_v2 = vld [vmem:[%s720_s3] sm:$0xff]  ;;  %v507_v9 = vmov 0.0|0.0  }
  0x27   :  { %429 = vset.pattern.permute.xlu1 %v506_v0  ;;  %428 = vset.pattern.permute.xlu0 %v506_v0  ;;  %v90_v3 = vld [vmem:[%s720_s3 + $0x18] sm:$0xff]  ;;  %v88_v4 = vld [vmem:[%s720_s3 + $0x8] sm:$0xff]  ;;  %v91_v6 = vld [vmem:[%s720_s3 + $0x20] sm:$0xff]  ;;  %vm508_vm0 = vmmov 0   ;;  %v509_v18 = vmov 0.0   ;;  %s510_s9 = smov [#allocation8]  }
  0x28   :  { %116 = vperm.xlu1 %429, %v89_v1   ;;  %106 = vperm.xlu0 %428, %v87_v2   ;;  %v92_v5 = vld [vmem:[%s720_s3 + $0x28] sm:$0xff]  ;;  %v94_v7 = vld [vmem:[%s720_s3 + $0x38] sm:$0xff]  ;;  %v93_v8 = vld [vmem:[%s720_s3 + $0x30] sm:$0xff]  ;;  %s331_s10 = sshll.u32 %s510_s9, 4  ;;  %s332_s10 = int_to_ptr.vmem [resolvable:$true] %s331_s10 }
  0x29   :  { %395 = vmatprep.subr.bf16.mxu0 %v507_v9  ;;  %v96_v10 = vld [vmem:[%s720_s3 + $0x48] sm:$0xff]  ;;  %v95_v11 = vld [vmem:[%s720_s3 + $0x40] sm:$0xff]  ;;  %v98_v12 = vld [vmem:[%s720_s3 + $0x58] sm:$0xff]  ;;  %392 = vmatprep.mubr.msk.f32.mxu0 %vm508_vm0, %v509_v18  ;;  %p479_p3 = scmp.lt.s32.totalorder %s332_s10, %s332_s10 }
  0x2a   :  { %v97_v13 = vld [vmem:[%s720_s3 + $0x50] sm:$0xff]  ;;  %v100_v14 = vld [vmem:[%s720_s3 + $0x68] sm:$0xff]  ;;  %v99_v15 = vld [vmem:[%s720_s3 + $0x60] sm:$0xff] }
  0x2b   :  { %v102_v16 = vld [vmem:[%s720_s3 + $0x78] sm:$0xff]  ;;  %v101_v17 = vld [vmem:[%s720_s3 + $0x70] sm:$0xff]  ;;  %v629_v19 = vld [vmem:[%s721_s4] ss:$0 sm:$0xff] }
  0x2c   :  { %121 = vperm.xlu1 %429, %v90_v3   ;;  %111 = vperm.xlu0 %428, %v88_v4   ;;  %v71_v23 = vld [vmem:[#allocation6] sm:$0xff]  ;;  %v72_v25 = vld [vmem:[#allocation6 + $0x8] sm:$0xff]  ;;  %v55_v29 = vld [vmem:[%s718_s1] sm:$0xff] }
  0x2d   :  { %v56_v30 = vld [vmem:[%s718_s1 + $0x8] sm:$0xff]  ;;  %v73_v34 = vld [vmem:[#allocation6 + $0x10] sm:$0xff]  ;;  %v74_v35 = vld [vmem:[#allocation6 + $0x18] sm:$0xff] }
  0x2e   :  { %v57_v41 = vld [vmem:[%s718_s1 + $0x10] sm:$0xff]  ;;  %v58_v42 = vld [vmem:[%s718_s1 + $0x18] sm:$0xff]  ;;  %v75_v50 = vld [vmem:[#allocation6 + $0x20] sm:$0xff] }
  0x2f   :  { %v76_v49 = vld [vmem:[#allocation6 + $0x28] sm:$0xff]  ;;  %v60_v54 = vld [vmem:[%s718_s1 + $0x28] sm:$0xff]  ;;  %v59_v55 = vld [vmem:[%s718_s1 + $0x20] sm:$0xff] }
  0x30   :  { %131 = vperm.xlu1 %429, %v92_v5   ;;  %126 = vperm.xlu0 %428, %v91_v6   ;;  %v78_v62 = vld [vmem:[#allocation6 + $0x38] sm:$0xff]  ;;  %v77_v63 = vld [vmem:[#allocation6 + $0x30] sm:$0xff]  ;;  %v61_v4 = vld [vmem:[%s718_s1 + $0x30] sm:$0xff] }
  0x31   :  { %v62_v3 = vld [vmem:[%s718_s1 + $0x38] sm:$0xff]  ;;  %v63_v18 = vld [vmem:[%s718_s1 + $0x40] sm:$0xff] }
  0x34   :  { %141 = vperm.xlu1 %429, %v94_v7   ;;  %136 = vperm.xlu0 %428, %v93_v8  }
  0x38   :  { %151 = vperm.xlu1 %429, %v96_v10   ;;  %146 = vperm.xlu0 %428, %v95_v11  }
  0x3c   :  { %161 = vperm.xlu1 %429, %v98_v12   ;;  %156 = vperm.xlu0 %428, %v97_v13   ;;  %v80_v12 = vld [vmem:[#allocation6 + $0x48] sm:$0xff]  ;;  %v79_v13 = vld [vmem:[#allocation6 + $0x40] sm:$0xff] }
  0x40   :  { %171 = vperm.xlu1 %429, %v100_v14   ;;  %166 = vperm.xlu0 %428, %v99_v15  }
  0x44   :  { %181 = vperm.xlu1 %429, %v102_v16   ;;  %176 = vperm.xlu0 %428, %v101_v17   ;;  %v64_v17 = vld [vmem:[%s718_s1 + $0x48] sm:$0xff] }
  0xa7   :  { %v117_v20 = vpop.permute.xlu1 %116  ;;  %v107_v21 = vpop.permute.xlu0 %106 }
  0xa8   :  { %v190_v22 = vmul.f32 %v629_v19, %v107_v21  ;;  %v192_v31 = vmul.f32 %v629_v19, %v117_v20 }
  0xaa   :  { %v206_v26 = vmul.f32 %v190_v22, %v71_v23  ;;  %v208_v38 = vmul.f32 %v192_v31, %v73_v34  ;;  %v66_v31 = vld [vmem:[%s718_s1 + $0x58] sm:$0xff] }
  0xab   :  { %v112_v24 = vpop.permute.xlu0 %111  ;;  %v122_v28 = vpop.permute.xlu1 %121 }
  0xac   :  { %v191_v27 = vmul.f32 %v629_v19, %v112_v24  ;;  %v193_v32 = vmul.f32 %v629_v19, %v122_v28  ;;  %v222_v36 = vadd.f32 %v206_v26, %v55_v29  ;;  %v224_v45 = vadd.f32 %v208_v38, %v57_v41  ;;  %v82_v26 = vld [vmem:[#allocation6 + $0x58] sm:$0xff] }
  0xae   :  { %v207_v33 = vmul.f32 %v191_v27, %v72_v25  ;;  %v209_v39 = vmul.f32 %v193_v32, %v74_v35  ;;  %v81_v27 = vld [vmem:[#allocation6 + $0x50] sm:$0xff]  ;;  %v65_v32 = vld [vmem:[%s718_s1 + $0x50] sm:$0xff] }
  0xaf   :  { %v132_v43 = vpop.permute.xlu1 %131  ;;  %v127_v44 = vpop.permute.xlu0 %126 }
  0xb0   :  { %v223_v37 = vadd.f32 %v207_v33, %v56_v30  ;;  %v225_v46 = vadd.f32 %v209_v39, %v58_v42  ;;  %v195_v47 = vmul.f32 %v629_v19, %v132_v43  ;;  %v194_v48 = vmul.f32 %v629_v19, %v127_v44  ;;  %v84_v39 = vld [vmem:[#allocation6 + $0x68] sm:$0xff]  ;;  %v68_v44 = vld [vmem:[%s718_s1 + $0x68] sm:$0xff] }
  0xb2   :  { %v396_v40 = vpack.c.bf16 %v223_v37, %v222_v36  ;;  %v211_v51 = vmul.f32 %v195_v47, %v76_v49  ;;  %v210_v52 = vmul.f32 %v194_v48, %v75_v50  ;;  %v399_v53 = vpack.c.bf16 %v225_v46, %v224_v45  ;;  %v67_v45 = vld [vmem:[%s718_s1 + $0x60] sm:$0xff] }
  0xb3   :  { %v142_v56 = vpop.permute.xlu1 %141  ;;  %v137_v57 = vpop.permute.xlu0 %136 }
  0xb4   :  { %397 = vmatpush3.bf16.xpose.msra.mxu0 %v396_v40  ;;  %v227_v58 = vadd.f32 %v211_v51, %v60_v54  ;;  %v226_v59 = vadd.f32 %v210_v52, %v59_v55  ;;  %v197_v60 = vmul.f32 %v629_v19, %v142_v56  ;;  %v196_v61 = vmul.f32 %v629_v19, %v137_v57  ;;  %v83_v40 = vld [vmem:[#allocation6 + $0x60] sm:$0xff]  ;;  %v86_v52 = vld [vmem:[#allocation6 + $0x78] sm:$0xff]  ;;  %v70_v57 = vld [vmem:[%s718_s1 + $0x78] sm:$0xff] }
  0xb5   :  { %398 = vmatprep.subr.bf16.mxu0 %v507_v9 }
  0xb6   :  { %v213_v0 = vmul.f32 %v197_v60, %v78_v62  ;;  %v212_v1 = vmul.f32 %v196_v61, %v77_v63  ;;  %v402_v2 = vpack.c.bf16 %v227_v58, %v226_v59  ;;  %v69_v58 = vld [vmem:[%s718_s1 + $0x70] sm:$0xff]  ;;  %v342_v62 = vld [vmem:[%s722_s5] ss:$0 sm:$0xff]  ;;  %s474_s1 = scalar_lea.vmem %s332_s10, 128 }
  0xb7   :  { %v152_v5 = vpop.permute.xlu1 %151  ;;  %v147_v6 = vpop.permute.xlu0 %146  ;;  %p475_p2 = scmp.ne.s32.totalorder %s332_s10, %s474_s1  ;;  %p480_p4 = scmp.lt.s32.totalorder %s474_s1, %s474_s1 }
  0xb8   :  { %v229_v7 = vadd.f32 %v213_v0, %v62_v3  ;;  %v228_v8 = vadd.f32 %v212_v1, %v61_v4  ;;  %v199_v10 = vmul.f32 %v629_v19, %v152_v5  ;;  %v198_v11 = vmul.f32 %v629_v19, %v147_v6 }
  0xb9   :  { %p481_p5 = por %p480_p4, %p479_p3 }
  0xba   :  { %v215_v14 = vmul.f32 %v199_v10, %v80_v12  ;;  %v214_v15 = vmul.f32 %v198_v11, %v79_v13  ;;  %v405_v16 = vpack.c.bf16 %v229_v7, %v228_v8 }
  0xbb   :  { %v162_v20 = vpop.permute.xlu1 %161  ;;  %v157_v21 = vpop.permute.xlu0 %156  ;;  %p482_p6 = pnand %p481_p5, %p475_p2 }
  0xbc   :  { %400 = vmatpush3.bf16.xpose.msra.mxu0 %v399_v53  ;;  %v231_v22 = vadd.f32 %v215_v14, %v64_v17  ;;  %v230_v23 = vadd.f32 %v214_v15, %v63_v18  ;;  %v201_v24 = vmul.f32 %v629_v19, %v162_v20  ;;  %v200_v25 = vmul.f32 %v629_v19, %v157_v21  ;;  %v85_v53 = vld [vmem:[#allocation6 + $0x70] sm:$0xff] }
  0xbd   :  { %401 = vmatprep.subr.bf16.mxu0 %v507_v9 }
  0xbe   :  { %v217_v28 = vmul.f32 %v201_v24, %v82_v26  ;;  %v216_v29 = vmul.f32 %v200_v25, %v81_v27  ;;  %v408_v30 = vpack.c.bf16 %v231_v22, %v230_v23 }
  0xbf   :  { %v172_v33 = vpop.permute.xlu1 %171  ;;  %v167_v34 = vpop.permute.xlu0 %166 }
  0xc0   :  { %v233_v35 = vadd.f32 %v217_v28, %v66_v31  ;;  %v232_v36 = vadd.f32 %v216_v29, %v65_v32  ;;  %v203_v37 = vmul.f32 %v629_v19, %v172_v33  ;;  %v202_v38 = vmul.f32 %v629_v19, %v167_v34 }
  0xc2   :  { %v219_v41 = vmul.f32 %v203_v37, %v84_v39  ;;  %v218_v42 = vmul.f32 %v202_v38, %v83_v40  ;;  %v411_v43 = vpack.c.bf16 %v233_v35, %v232_v36 }
  0xc3   :  { %v182_v46 = vpop.permute.xlu1 %181  ;;  %v177_v47 = vpop.permute.xlu0 %176 }
  0xc4   :  { %403 = vmatpush3.bf16.xpose.msra.mxu0 %v402_v2  ;;  %v235_v48 = vadd.f32 %v219_v41, %v68_v44  ;;  %v234_v49 = vadd.f32 %v218_v42, %v67_v45  ;;  %v205_v50 = vmul.f32 %v629_v19, %v182_v46  ;;  %v204_v51 = vmul.f32 %v629_v19, %v177_v47  ;;  %v239_v19 = vld [vmem:[#allocation3] sm:$0xff] }
  0xc5   :  { %404 = vmatprep.subr.bf16.mxu0 %v507_v9 }
  0xc6   :  { %v221_v54 = vmul.f32 %v205_v50, %v86_v52  ;;  %v220_v55 = vmul.f32 %v204_v51, %v85_v53  ;;  %v414_v56 = vpack.c.bf16 %v235_v48, %v234_v49 }
  0xc8   :  { %v237_v59 = vadd.f32 %v221_v54, %v70_v57  ;;  %v236_v60 = vadd.f32 %v220_v55, %v69_v58 }
  0xca   :  { %v417_v61 = vpack.c.bf16 %v237_v59, %v236_v60 }
  0xcc   :  { %406 = vmatpush3.bf16.xpose.msra.mxu0 %v405_v16 }
  0xcd   :  { %407 = vmatprep.subr.bf16.mxu0 %v507_v9 }
  0xd4   :  { %409 = vmatpush3.bf16.xpose.msra.mxu0 %v408_v30 }
  0xd5   :  { %410 = vmatprep.subr.bf16.mxu0 %v507_v9 }
  0xdc   :  { %412 = vmatpush3.bf16.xpose.msra.mxu0 %v411_v43 }
  0xdd   :  { %413 = vmatprep.subr.bf16.mxu0 %v507_v9 }
  0xe4   :  { %415 = vmatpush3.bf16.xpose.msra.mxu0 %v414_v56 }
  0xe5   :  { %416 = vmatprep.subr.bf16.mxu0 %v507_v9 }
  0xec   :  { %418 = vmatpush3.bf16.xpose.msra.mxu0 %v417_v61 }
  0xf3   :  { %393 = vmatmul.mubr.f32.vlgmr.msra.gmra.mrb[0].mxu0 %v239_v19 }
 0x1c6   :  { %v306_v63 = vpop.f32.mrb[0].mxu0 }
 0x1c7   :  { %v323_v0 = vadd.f32 %v342_v62, %v306_v63  ;;  %v394_v1 = vpop.f32.mrb[1].mxu0 }
 0x1c9   :  { %324 = vst [vmem:[#allocation8] sm:$0xff] %v323_v0 }
 0x1ca   :  { %485 = shalt.err (!%p482_p6)
}
 0x1cb   :  { %s486_s13 = scalar_lea.hbm %s723_s6, 128 }
 0x1cc   :  { %p487_p7 = scmp.ne.s32.totalorder %s723_s6, %s486_s13  ;;  %p490_p8 = scmp.lt.u32.totalorder %s486_s13, %s723_s6 }
 0x1ce   :  { %p492_p9 = pnand %p490_p8, %p487_p7 }
 0x1d0   :  { %495 = shalt.err (!%p492_p9)
}
 0x1d1   :  { %334 = dma.vmem_to_hbm [thread:$0]  %s332_s10, 128, %s723_s6, [#allocation5]  }
 0x1d2   :  { %500 = dma.done.wait [#allocation5], 128  }
 0x1d3   :  { %501 = vsyncadd [#allocation5], 4294967168 }
 0x1d4   :  { %338 = vsyncpa [#allocation4], 1 }
 0x1d5   :  { %339 = vsyncpa [#allocation7], 1 }
 0x1d6   :  { %340 = vsyncpa [#allocation5], 1 }

</bundles_post_ra>
